<compile_context>
chip_gen: v6e
topology: v6e:2x2x1
jax: 0.10.0
libtpu: 0.0.40
codegen_flags: <defaults>
</compile_context>

<pallas_src>
import functools

import jax
import jax.numpy as jnp
from jax import lax
from jax.experimental import pallas as pl
from jax.experimental.pallas import tpu as pltpu

_LANES = 128


# ---------------------------------------------------------------------------
# Kernel
# ---------------------------------------------------------------------------
def _giou_per_box(n_ref, pred_ref, tgt_ref, shape, eps):
    """Masked per-box GIoU loss for one (S_blk, 128) tile.

    pred_ref / tgt_ref: (4, S_blk, 128) f32 blocks, planes = x1, y1, x2, y2.
    n_ref: SMEM scalar prefetch, n_ref[0] = number of valid boxes.
    """
    px1 = pred_ref[0]
    py1 = pred_ref[1]
    px2 = pred_ref[2]
    py2 = pred_ref[3]
    tx1 = tgt_ref[0]
    ty1 = tgt_ref[1]
    tx2 = tgt_ref[2]
    ty2 = tgt_ref[3]

    area_p = (px2 - px1) * (py2 - py1)
    area_t = (tx2 - tx1) * (ty2 - ty1)

    # intersection
    iw = jnp.maximum(jnp.minimum(px2, tx2) - jnp.maximum(px1, tx1), 0.0)
    ih = jnp.maximum(jnp.minimum(py2, ty2) - jnp.maximum(py1, ty1), 0.0)
    overlap = iw * ih

    union = jnp.maximum(area_p + area_t - overlap, eps)
    ious = overlap * pl.reciprocal(union, approx=True)

    # smallest enclosing box
    ew = jnp.maximum(jnp.maximum(px2, tx2) - jnp.minimum(px1, tx1), 0.0)
    eh = jnp.maximum(jnp.maximum(py2, ty2) - jnp.minimum(py1, ty1), 0.0)
    enclose = jnp.maximum(ew * eh, eps)

    gious = ious - (enclose - union) * pl.reciprocal(enclose, approx=True)
    loss = 1.0 - gious

    # validity mask built in-kernel (no HBM mask stream): global index < n.
    block_boxes = shape[0] * shape[1]
    gidx = (pl.program_id(0) * block_boxes
            + lax.broadcasted_iota(jnp.int32, shape, 0) * shape[1]
            + lax.broadcasted_iota(jnp.int32, shape, 1))
    valid = (gidx < n_ref[0]).astype(jnp.float32)
    return loss * valid


def _accumulate(loss, loss_ref, sum_ref):
    @pl.when(pl.program_id(0) == 0)
    def _():
        sum_ref[...] = jnp.zeros_like(sum_ref)

    loss_ref[...] = loss
    sum_ref[...] += jnp.sum(loss, keepdims=True)


def _giou_kernel(n_ref, pred_ref, tgt_ref, loss_ref, sum_ref, *, eps):
    loss = _giou_per_box(n_ref, pred_ref, tgt_ref, loss_ref.shape, eps)
    _accumulate(loss, loss_ref, sum_ref)


def _giou_kernel_weighted(n_ref, pred_ref, tgt_ref, w_ref, loss_ref, sum_ref,
                          *, eps):
    loss = _giou_per_box(n_ref, pred_ref, tgt_ref, loss_ref.shape, eps)
    loss = loss * w_ref[...]
    _accumulate(loss, loss_ref, sum_ref)


# ---------------------------------------------------------------------------
# Wrapper
# ---------------------------------------------------------------------------
def _block_rows(n):
    """Sublane rows per grid block: up to 256 rows (=32768 boxes / step,
    ~2.5 MiB resident VMEM with double buffering -> safe on v5e/v6e/v7x),
    but no larger than needed for small n."""
    s_needed = max(1, -(-n // _LANES))
    return min(256, -(-s_needed // 8) * 8)


@functools.partial(jax.jit, static_argnames=("eps",))
def _giou_forward(pred, target, weight, *, eps):
    """pred/target: (n, 4) f32; weight: (n,) f32 or None.

    Returns (per_box_loss (n,), loss_sum ()) -- both masked/weighted.
    """
    n = pred.shape[0]
    s_blk = _block_rows(n)
    blk_boxes = s_blk * _LANES
    num_blocks = -(-n // blk_boxes)
    n_pad = num_blocks * blk_boxes
    s_total = n_pad // _LANES

    def pack_boxes(b):
        # (n, 4) -> coordinate-major, sublane-dense (4, S_total, 128).
        b = jnp.pad(jnp.transpose(b.astype(jnp.float32)),
                    ((0, 0), (0, n_pad - n)))
        return b.reshape(4, s_total, _LANES)

    pred_p = pack_boxes(pred)
    tgt_p = pack_boxes(target)
    n_arr = jnp.array([n], dtype=jnp.int32)

    box_spec = pl.BlockSpec((4, s_blk, _LANES), lambda i, n_ref: (0, i, 0))
    plane_spec = pl.BlockSpec((s_blk, _LANES), lambda i, n_ref: (i, 0))
    sum_spec = pl.BlockSpec((1, 1), lambda i, n_ref: (0, 0))

    out_shape = (jax.ShapeDtypeStruct((s_total, _LANES), jnp.float32),
                 jax.ShapeDtypeStruct((1, 1), jnp.float32))
    compiler_params = pltpu.CompilerParams(
        # carried sum accumulator across the box-grid axis
        dimension_semantics=("arbitrary",),
        vmem_limit_bytes=32 * 1024 * 1024,
    )

    if weight is None:
        loss_p, total = pl.pallas_call(
            functools.partial(_giou_kernel, eps=eps),
            out_shape=out_shape,
            grid_spec=pltpu.PrefetchScalarGridSpec(
                num_scalar_prefetch=1,
                grid=(num_blocks,),
                in_specs=[box_spec, box_spec],
                out_specs=(plane_spec, sum_spec)),
            compiler_params=compiler_params,
        )(n_arr, pred_p, tgt_p)
    else:
        w_p = jnp.pad(weight.astype(jnp.float32),
                      (0, n_pad - n)).reshape(s_total, _LANES)
        loss_p, total = pl.pallas_call(
            functools.partial(_giou_kernel_weighted, eps=eps),
            out_shape=out_shape,
            grid_spec=pltpu.PrefetchScalarGridSpec(
                num_scalar_prefetch=1,
                grid=(num_blocks,),
                in_specs=[box_spec, box_spec, plane_spec],
                out_specs=(plane_spec, sum_spec)),
            compiler_params=compiler_params,
        )(n_arr, pred_p, tgt_p, w_p)

    per_box = loss_p.reshape(n_pad)[:n]
    return per_box, total[0, 0]


class GIoULoss:
    """JAX/Pallas port of the PyTorch GIoULoss module (forward only)."""

    def __init__(self, eps: float = 1e-6, reduction: str = "mean",
                 loss_weight: float = 1.0):
        self.eps = eps
        self.reduction = reduction
        self.loss_weight = loss_weight

    def __call__(self, pred, target, weight=None, avg_factor=None,
                 reduction_override=None):
        assert reduction_override in (None, "none", "mean", "sum")
        reduction = reduction_override if reduction_override else self.reduction

        # NOTE: the PyTorch `not torch.any(weight > 0)` early exit is a
        # host-synchronizing, non-jittable check; the masked kernel already
        # yields exactly 0 for all-zero weights, so we rely on it instead.
        # TODO(synk): the all-non-positive *negative* weight corner case of the
        # original early exit is not reproduced (forward value only).

        if weight is not None and weight.ndim > 1:
            assert weight.shape == pred.shape
            weight = weight.mean(-1)

        per_box, total = _giou_forward(pred, target, weight, eps=self.eps)

        n = pred.shape[0]
        if reduction == "none":
            out = per_box
        elif reduction == "sum":
            out = total
        else:  # "mean"
            if avg_factor is not None:
                out = total / avg_factor
            else:
                out = total / n
        return self.loss_weight * out


# ---------------------------------------------------------------------------
# Demo / self-check
# ---------------------------------------------------------------------------
def _reference_giou_loss(pred, target, eps):
    ap = (pred[:, 2] - pred[:, 0]) * (pred[:, 3] - pred[:, 1])
    at = (target[:, 2] - target[:, 0]) * (target[:, 3] - target[:, 1])
    iw = jnp.maximum(jnp.minimum(pred[:, 2], target[:, 2])
                     - jnp.maximum(pred[:, 0], target[:, 0]), 0.0)
    ih = jnp.maximum(jnp.minimum(pred[:, 3], target[:, 3])
                     - jnp.maximum(pred[:, 1], target[:, 1]), 0.0)
    overlap = iw * ih
    union = jnp.maximum(ap + at - overlap, eps)
    ious = overlap / union
    ew = jnp.maximum(jnp.maximum(pred[:, 2], target[:, 2])
                     - jnp.minimum(pred[:, 0], target[:, 0]), 0.0)
    eh = jnp.maximum(jnp.maximum(pred[:, 3], target[:, 3])
                     - jnp.minimum(pred[:, 1], target[:, 1]), 0.0)
    enclose = jnp.maximum(ew * eh, eps)
    gious = ious - (enclose - union) / enclose
    return 1.0 - gious


if __name__ == "__main__":
    key = jax.random.PRNGKey(0)
    k1, k2, k3, k4, k5 = jax.random.split(key, 5)

    n = 8  # number of boxes
    # build well-formed (x1, y1, x2, y2) boxes
    p_xy = jax.random.uniform(k1, (n, 2), minval=0.0, maxval=10.0)
    p_wh = jax.random.uniform(k2, (n, 2), minval=0.5, maxval=5.0)
    pred = jnp.concatenate([p_xy, p_xy + p_wh], axis=-1).astype(jnp.float32)

    t_xy = jax.random.uniform(k3, (n, 2), minval=0.0, maxval=10.0)
    t_wh = jax.random.uniform(k4, (n, 2), minval=0.5, maxval=5.0)
    target = jnp.concatenate([t_xy, t_xy + t_wh], axis=-1).astype(jnp.float32)

    weight = jax.random.uniform(k5, (n,), minval=0.5, maxval=1.5)

    loss_fn = GIoULoss(eps=1e-6, reduction="mean", loss_weight=1.0)

    loss_mean = loss_fn(pred, target)
    loss_weighted = loss_fn(pred, target, weight=weight)
    loss_none = loss_fn(pred, target, reduction_override="none")
    jax.block_until_ready((loss_mean, loss_weighted, loss_none))

    # loose-tolerance check against a pure-JAX reference (approx reciprocal
    # introduces ~1e-4 relative error)
    ref = _reference_giou_loss(pred, target, 1e-6)
    assert jnp.allclose(loss_none, ref, rtol=1e-2, atol=1e-2)
    assert jnp.allclose(loss_mean, ref.mean(), rtol=1e-2, atol=1e-2)
    assert jnp.allclose(loss_weighted, (ref * weight).sum() / n,
                        rtol=1e-2, atol=1e-2)

    print("KERNEL_OK")
</pallas_src>

<mosaic_0001>
module attributes {stable_mosaic.version = 11 : i64} {
  func.func @_giou_kernel(%arg0: i32, %arg1: memref<1xi32, #tpu.memory_space<smem>>, %arg2: memref<4x8x128xf32, #tpu.memory_space<vmem>>, %arg3: memref<4x8x128xf32, #tpu.memory_space<vmem>>, %arg4: memref<8x128xf32, #tpu.memory_space<vmem>>, %arg5: memref<1x1xf32, #tpu.memory_space<vmem>>) attributes {dimension_semantics = [#tpu.dimension_semantics<arbitrary>], iteration_bounds = array<i64: 1>, scalar_prefetch = 1 : i64, scratch_operands = 0 : i64, tpu.core_type = #tpu.core_type<tc>, window_params = [{transform_indices = @transform_0, window_bounds = array<i64: 4, 8, 128>}, {transform_indices = @transform_1, window_bounds = array<i64: 4, 8, 128>}, {transform_indices = @transform_2, window_bounds = array<i64: 8, 128>}, {pipeline_mode = #tpu.pipeline_mode<synchronous>, transform_indices = @transform_3, window_bounds = array<i64: 1, 1>}]} {
    %c0 = arith.constant 0 : index
    %c0_0 = arith.constant 0 : index
    %c0_1 = arith.constant 0 : index
    %0 = vector.load %arg2[%c0, %c0_0, %c0_1] : memref<4x8x128xf32, #tpu.memory_space<vmem>>, vector<1x8x128xf32>
    %1 = vector.shape_cast %0 : vector<1x8x128xf32> to vector<8x128xf32>
    %c1 = arith.constant 1 : index
    %c0_2 = arith.constant 0 : index
    %c0_3 = arith.constant 0 : index
    %2 = vector.load %arg2[%c1, %c0_2, %c0_3] : memref<4x8x128xf32, #tpu.memory_space<vmem>>, vector<1x8x128xf32>
    %3 = vector.shape_cast %2 : vector<1x8x128xf32> to vector<8x128xf32>
    %c2 = arith.constant 2 : index
    %c0_4 = arith.constant 0 : index
    %c0_5 = arith.constant 0 : index
    %4 = vector.load %arg2[%c2, %c0_4, %c0_5] : memref<4x8x128xf32, #tpu.memory_space<vmem>>, vector<1x8x128xf32>
    %5 = vector.shape_cast %4 : vector<1x8x128xf32> to vector<8x128xf32>
    %c3 = arith.constant 3 : index
    %c0_6 = arith.constant 0 : index
    %c0_7 = arith.constant 0 : index
    %6 = vector.load %arg2[%c3, %c0_6, %c0_7] : memref<4x8x128xf32, #tpu.memory_space<vmem>>, vector<1x8x128xf32>
    %7 = vector.shape_cast %6 : vector<1x8x128xf32> to vector<8x128xf32>
    %c0_8 = arith.constant 0 : index
    %c0_9 = arith.constant 0 : index
    %c0_10 = arith.constant 0 : index
    %8 = vector.load %arg3[%c0_8, %c0_9, %c0_10] : memref<4x8x128xf32, #tpu.memory_space<vmem>>, vector<1x8x128xf32>
    %9 = vector.shape_cast %8 : vector<1x8x128xf32> to vector<8x128xf32>
    %c1_11 = arith.constant 1 : index
    %c0_12 = arith.constant 0 : index
    %c0_13 = arith.constant 0 : index
    %10 = vector.load %arg3[%c1_11, %c0_12, %c0_13] : memref<4x8x128xf32, #tpu.memory_space<vmem>>, vector<1x8x128xf32>
    %11 = vector.shape_cast %10 : vector<1x8x128xf32> to vector<8x128xf32>
    %c2_14 = arith.constant 2 : index
    %c0_15 = arith.constant 0 : index
    %c0_16 = arith.constant 0 : index
    %12 = vector.load %arg3[%c2_14, %c0_15, %c0_16] : memref<4x8x128xf32, #tpu.memory_space<vmem>>, vector<1x8x128xf32>
    %13 = vector.shape_cast %12 : vector<1x8x128xf32> to vector<8x128xf32>
    %c3_17 = arith.constant 3 : index
    %c0_18 = arith.constant 0 : index
    %c0_19 = arith.constant 0 : index
    %14 = vector.load %arg3[%c3_17, %c0_18, %c0_19] : memref<4x8x128xf32, #tpu.memory_space<vmem>>, vector<1x8x128xf32>
    %15 = vector.shape_cast %14 : vector<1x8x128xf32> to vector<8x128xf32>
    %16 = arith.subf %5, %1 : vector<8x128xf32>
    %17 = arith.subf %7, %3 : vector<8x128xf32>
    %18 = arith.mulf %16, %17 : vector<8x128xf32>
    %19 = arith.subf %13, %9 : vector<8x128xf32>
    %20 = arith.subf %15, %11 : vector<8x128xf32>
    %21 = arith.mulf %19, %20 : vector<8x128xf32>
    %22 = arith.minimumf %5, %13 : vector<8x128xf32>
    %23 = arith.maximumf %1, %9 : vector<8x128xf32>
    %24 = arith.subf %22, %23 : vector<8x128xf32>
    %cst = arith.constant 0.000000e+00 : f32
    %25 = vector.broadcast %cst : f32 to vector<8x128xf32>
    %26 = arith.maximumf %24, %25 : vector<8x128xf32>
    %27 = arith.minimumf %7, %15 : vector<8x128xf32>
    %28 = arith.maximumf %3, %11 : vector<8x128xf32>
    %29 = arith.subf %27, %28 : vector<8x128xf32>
    %cst_20 = arith.constant 0.000000e+00 : f32
    %30 = vector.broadcast %cst_20 : f32 to vector<8x128xf32>
    %31 = arith.maximumf %29, %30 : vector<8x128xf32>
    %32 = arith.mulf %26, %31 : vector<8x128xf32>
    %33 = arith.addf %18, %21 : vector<8x128xf32>
    %34 = arith.subf %33, %32 : vector<8x128xf32>
    %cst_21 = arith.constant 9.99999997E-7 : f32
    %35 = vector.broadcast %cst_21 : f32 to vector<8x128xf32>
    %36 = arith.maximumf %34, %35 : vector<8x128xf32>
    %37 = tpu.reciprocal %36 {approx = true} : vector<8x128xf32> -> vector<8x128xf32>
    %38 = arith.mulf %32, %37 : vector<8x128xf32>
    %39 = arith.maximumf %5, %13 : vector<8x128xf32>
    %40 = arith.minimumf %1, %9 : vector<8x128xf32>
    %41 = arith.subf %39, %40 : vector<8x128xf32>
    %cst_22 = arith.constant 0.000000e+00 : f32
    %42 = vector.broadcast %cst_22 : f32 to vector<8x128xf32>
    %43 = arith.maximumf %41, %42 : vector<8x128xf32>
    %44 = arith.maximumf %7, %15 : vector<8x128xf32>
    %45 = arith.minimumf %3, %11 : vector<8x128xf32>
    %46 = arith.subf %44, %45 : vector<8x128xf32>
    %cst_23 = arith.constant 0.000000e+00 : f32
    %47 = vector.broadcast %cst_23 : f32 to vector<8x128xf32>
    %48 = arith.maximumf %46, %47 : vector<8x128xf32>
    %49 = arith.mulf %43, %48 : vector<8x128xf32>
    %cst_24 = arith.constant 9.99999997E-7 : f32
    %50 = vector.broadcast %cst_24 : f32 to vector<8x128xf32>
    %51 = arith.maximumf %49, %50 : vector<8x128xf32>
    %52 = arith.subf %51, %36 : vector<8x128xf32>
    %53 = tpu.reciprocal %51 {approx = true} : vector<8x128xf32> -> vector<8x128xf32>
    %54 = arith.mulf %52, %53 : vector<8x128xf32>
    %55 = arith.subf %38, %54 : vector<8x128xf32>
    %cst_25 = arith.constant 1.000000e+00 : f32
    %56 = vector.broadcast %cst_25 : f32 to vector<8x128xf32>
    %57 = arith.subf %56, %55 : vector<8x128xf32>
    %c1024_i32 = arith.constant 1024 : i32
    %58 = arith.muli %arg0, %c1024_i32 : i32
    %59 = tpu.iota {dimensions = array<i32: 0>} : vector<8x128xi32>
    %c128_i32 = arith.constant 128 : i32
    %60 = vector.broadcast %c128_i32 : i32 to vector<8x128xi32>
    %61 = arith.muli %59, %60 : vector<8x128xi32>
    %62 = vector.broadcast %58 : i32 to vector<8x128xi32>
    %63 = arith.addi %62, %61 : vector<8x128xi32>
    %64 = tpu.iota {dimensions = array<i32: 1>} : vector<8x128xi32>
    %65 = arith.addi %63, %64 : vector<8x128xi32>
    %c0_26 = arith.constant 0 : index
    %66 = memref.load %arg1[%c0_26] : memref<1xi32, #tpu.memory_space<smem>>
    %67 = vector.broadcast %66 : i32 to vector<8x128xi32>
    %68 = arith.cmpi slt, %65, %67 : vector<8x128xi32>
    %69 = arith.extui %68 : vector<8x128xi1> to vector<8x128xi32>
    %70 = arith.sitofp %69 : vector<8x128xi32> to vector<8x128xf32>
    %71 = arith.mulf %57, %70 : vector<8x128xf32>
    %c0_i32 = arith.constant 0 : i32
    %72 = arith.cmpi eq, %arg0, %c0_i32 : i32
    %73 = arith.extui %72 : i1 to i32
    %c0_i32_27 = arith.constant 0 : i32
    %74 = arith.cmpi ne, %73, %c0_i32_27 : i32
    scf.if %74 {
      %cst_35 = arith.constant 0.000000e+00 : f32
      %84 = vector.broadcast %cst_35 : f32 to vector<1x1xf32>
      %c0_36 = arith.constant 0 : index
      %c0_37 = arith.constant 0 : index
      %85 = vector.load %arg5[%c0_36, %c0_37] : memref<1x1xf32, #tpu.memory_space<vmem>>, vector<1x1xf32>
      tpu.vector_store %arg5[%c0_36, %c0_37], %84 {strides = array<i32>} : memref<1x1xf32, #tpu.memory_space<vmem>>, vector<1x1xf32>,
    } else {
    }
    %c0_28 = arith.constant 0 : index
    %c0_29 = arith.constant 0 : index
    %75 = vector.load %arg4[%c0_28, %c0_29] : memref<8x128xf32, #tpu.memory_space<vmem>>, vector<8x128xf32>
    tpu.vector_store %arg4[%c0_28, %c0_29], %71 {strides = array<i32>} : memref<8x128xf32, #tpu.memory_space<vmem>>, vector<8x128xf32>,
    %c0_30 = arith.constant 0 : index
    %c0_31 = arith.constant 0 : index
    %76 = vector.load %arg5[%c0_30, %c0_31] : memref<1x1xf32, #tpu.memory_space<vmem>>, vector<1x1xf32>
    %77 = vector.shape_cast %71 : vector<8x128xf32> to vector<1x8x128xf32>
    %cst_32 = arith.constant dense<0.000000e+00> : vector<1xf32>
    %78 = vector.multi_reduction <add>, %77, %cst_32 [1, 2] : vector<1x8x128xf32> to vector<1xf32>
    %79 = vector.shape_cast %78 : vector<1xf32> to vector<1x1x1xf32>
    %80 = vector.extract %79[0, 0, 0] : f32 from vector<1x1x1xf32>
    %81 = vector.broadcast %80 : f32 to vector<1x1xf32>
    %82 = arith.addf %76, %81 : vector<1x1xf32>
    %c0_33 = arith.constant 0 : index
    %c0_34 = arith.constant 0 : index
    %83 = vector.load %arg5[%c0_33, %c0_34] : memref<1x1xf32, #tpu.memory_space<vmem>>, vector<1x1xf32>
    tpu.vector_store %arg5[%c0_33, %c0_34], %82 {strides = array<i32>} : memref<1x1xf32, #tpu.memory_space<vmem>>, vector<1x1xf32>,
    return
  }
  func.func @transform_0(%arg0: i32, %arg1: memref<1xi32, #tpu.memory_space<smem>>) -> (i32, i32, i32) {
    %c0_i32 = arith.constant 0 : i32
    %c0_i32_0 = arith.constant 0 : i32
    %c0_i32_1 = arith.constant 0 : i32
    return %c0_i32, %arg0, %c0_i32_0 : i32, i32, i32
  }
  func.func @transform_1(%arg0: i32, %arg1: memref<1xi32, #tpu.memory_space<smem>>) -> (i32, i32, i32) {
    %c0_i32 = arith.constant 0 : i32
    %c0_i32_0 = arith.constant 0 : i32
    %c0_i32_1 = arith.constant 0 : i32
    return %c0_i32, %arg0, %c0_i32_0 : i32, i32, i32
  }
  func.func @transform_2(%arg0: i32, %arg1: memref<1xi32, #tpu.memory_space<smem>>) -> (i32, i32) {
    %c0_i32 = arith.constant 0 : i32
    %c0_i32_0 = arith.constant 0 : i32
    return %arg0, %c0_i32 : i32, i32
  }
  func.func @transform_3(%arg0: i32, %arg1: memref<1xi32, #tpu.memory_space<smem>>) -> (i32, i32) {
    %c0_i32 = arith.constant 0 : i32
    %c0_i32_0 = arith.constant 0 : i32
    %c0_i32_1 = arith.constant 0 : i32
    return %c0_i32, %c0_i32_0 : i32, i32
  }
}

</mosaic_0001>

<bundles_post_ra>
// kernel: _giou_forward.1
= control target key start
LH: loop header
LB: loop body
LE: loop exit
PB: predicated region body
PF: predicated region fallthrough
CT: control target
= control target key end

     0   :  { %vm84_vm0 = vcmask 0   ;;  %v156_v7 = vmov 0.0   ;;  %s218_s0 = inlined_call_operand.<no memory space> [shape: s32[1], index: 0, kind: input, shape index: {}]   ;;  %s219_s1 = inlined_call_operand.vmem [shape: f32[4,8,128], index: 1, kind: input, shape index: {}]   ;;  %s220_s2 = inlined_call_operand.vmem [shape: f32[4,8,128], index: 2, kind: input, shape index: {}]   ;;  %s221_s3 = inlined_call_operand.vmem [shape: f32[8,128], index: 3, kind: output, shape index: {0}]   ;;  %s222_s4 = inlined_call_operand.hbm [shape: f32[1,1], index: 4, kind: output, shape index: {1}]  }
   0x1   :  { %v16_v0 = vld [vmem:[%s219_s1] sm:$0xff]  ;;  %v119_v1 = vld [vmem:[%s219_s1 + $0x8] sm:$0xff]  ;;  %v120_v2 = vld [vmem:[%s219_s1 + $0x10] sm:$0xff]  ;;  %85 = vst.msk [vmem:[#allocation4] sm:$0x1] %vm84_vm0, %v156_v7 }
   0x2   :  { %v121_v3 = vld [vmem:[%s219_s1 + $0x18] sm:$0xff]  ;;  %v23_v4 = vld [vmem:[%s220_s2] sm:$0xff]  ;;  %v122_v5 = vld [vmem:[%s220_s2 + $0x8] sm:$0xff]  ;;  %v30_v6 = vsub.f32 %v120_v2, %v16_v0 }
   0x3   :  { %v123_v8 = vld [vmem:[%s220_s2 + $0x10] sm:$0xff]  ;;  %v124_v9 = vld [vmem:[%s220_s2 + $0x18] sm:$0xff]  ;;  %v31_v10 = vsub.f32 %v121_v3, %v119_v1  ;;  %v37_v11 = vmax.f32 %v16_v0, %v23_v4  ;;  %v41_v12 = vmax.f32 %v119_v1, %v122_v5  ;;  %v51_v13 = vmin.f32 %v16_v0, %v23_v4 }
   0x4   :  { %11 = vsyncpa [#allocation5], 0  ;;  %v33_v14 = vsub.f32 %v123_v8, %v23_v4  ;;  %v34_v15 = vsub.f32 %v124_v9, %v122_v5  ;;  %v36_v16 = vmin.f32 %v120_v2, %v123_v8  ;;  %v40_v17 = vmin.f32 %v121_v3, %v124_v9 }
   0x5   :  { %v32_v18 = vmul.f32 %v31_v10, %v30_v6  ;;  %v50_v19 = vmax.f32 %v120_v2, %v123_v8  ;;  %v54_v20 = vmax.f32 %v121_v3, %v124_v9  ;;  %v55_v21 = vmin.f32 %v119_v1, %v122_v5 }
   0x6   :  { %v35_v22 = vmul.f32 %v34_v15, %v33_v14  ;;  %v38_v23 = vsub.f32 %v36_v16, %v37_v11  ;;  %v42_v24 = vsub.f32 %v40_v17, %v41_v12  ;;  %v66_v37 = vlaneseq }
   0x7   :  { %v52_v25 = vsub.f32 %v50_v19, %v51_v13  ;;  %v56_v26 = vsub.f32 %v54_v20, %v55_v21  ;;  %v75_v43 = vstv %s218_s0  ;;  %s157_s0 = smov [#allocation4]  }
   0x8   :  { %v39_v27 = vmax.f32 %v38_v23, 0.0  ;;  %v43_v28 = vmax.f32 %v42_v24, 0.0  ;;  %v45_v29 = vadd.f32 %v35_v22, %v32_v18  ;;  %v67_v38 = vshrl.u32 %v66_v37, 7  ;;  %v87_v59 = vld [vmem:[#allocation4] sm:$0x1]  ;;  %s109_s7 = sshll.u32 %s157_s0, 4  ;;  %s110_s7 = int_to_ptr.vmem [resolvable:$true] %s109_s7 }
   0x9   :  { %v53_v30 = vmax.f32 %v52_v25, 0.0  ;;  %v57_v31 = vmax.f32 %v56_v26, 0.0  ;;  %v72_v40 = vand.u32 127, %v66_v37  ;;  %s134_s9 = scalar_lea.vmem %s110_s7, 16  ;;  %p139_p1 = scmp.lt.s32.totalorder %s110_s7, %s110_s7 }
   0xa   :  { %v44_v32 = vmul.f32 %v43_v28, %v39_v27  ;;  %v68_v39 = vmul.u32 128, %v67_v38  ;;  %p135_p0 = scmp.ne.s32.totalorder %s110_s7, %s134_s9 }
   0xb   :  { %v58_v33 = vmul.f32 %v57_v31, %v53_v30 }
   0xc   :  { %v46_v34 = vsub.f32 %v45_v29, %v44_v32  ;;  %v73_v42 = vadd.s32 %v72_v40, %v68_v39 }
   0xd   :  { %v59_v35 = vmax.f32 %v58_v33, 1e-06 }
   0xe   :  { %v47_v36 = vmax.f32 %v46_v34, 1e-06  ;;  %vm76_vm1 = vcmp.lt.s32.totalorder %v73_v42, %v75_v43 }
   0xf   :  { %130 = vrcp.f32 %v59_v35  ;;  %v125_v49 = vsel %vm76_vm1, 1.0, %v156_v7 }
  0x10   :  { %132 = vrcp.f32 %v47_v36  ;;  %v60_v41 = vsub.f32 %v59_v35, %v47_v36 }
  0x1c   :  { %v131_v44 = vpop.eup %130 }
  0x1d   :  { %v133_v45 = vpop.eup %132  ;;  %v62_v46 = vmul.f32 %v131_v44, %v60_v41 }
  0x1e   :  { %v49_v47 = vmul.f32 %v133_v45, %v44_v32 }
  0x20   :  { %v63_v48 = vsub.f32 %v49_v47, %v62_v46 }
  0x22   :  { %v64_v50 = vsub.f32 1.0, %v63_v48 }
  0x24   :  { %v79_v51 = vmul.f32 %v125_v49, %v64_v50 }
  0x26   :  { %86 = vst [vmem:[%s221_s3] sm:$0xff] %v79_v51  ;;  %88 = vadd.xlane.f32.xlu0 %v79_v51  ;;  %s138_s3 = scalar_lea.vmem %s110_s7, 32 }
  0x27   :  { %p140_p2 = scmp.lt.s32.totalorder %s138_s3, %s134_s9 }
  0x29   :  { %p141_p3 = por %p140_p2, %p139_p1 }
  0x2b   :  { %p142_p4 = pnand %p141_p3, %p135_p0 }
  0xaf   :  { %v89_v52 = vpop.xlane.xlu0 %88 }
  0xb0   :  { %v90_v53 = vrot.slane %v89_v52, 4 }
  0xb2   :  { %v91_v54 = vadd.f32 %v90_v53, %v89_v52 }
  0xb4   :  { %v92_v55 = vrot.slane %v91_v54, 2 }
  0xb6   :  { %v93_v56 = vadd.f32 %v92_v55, %v91_v54 }
  0xb8   :  { %v94_v57 = vrot.slane %v93_v56, 1 }
  0xba   :  { %v95_v58 = vadd.f32 %v94_v57, %v93_v56 }
  0xbc   :  { %126 = vpush %v95_v58 }
  0xed   :  { %s127_s8 = spop %126 }
  0xee   :  { %v97_v60 = vstv %s127_s8 }
  0xef   :  { %v98_v61 = vadd.f32 %v97_v60, %v87_v59 }
  0xf1   :  { %100 = vst.msk [vmem:[#allocation4] sm:$0x1] %vm84_vm0, %v98_v61 }
  0xf2   :  { %145 = shalt.err (!%p142_p4)
}
  0xf3   :  { %112 = dma.vmem_to_hbm [thread:$0]  %s110_s7, 16, %s222_s4, [#allocation5]  }
  0xf4   :  { %154 = dma.done.wait [#allocation5], 16  }
  0xf5   :  { %155 = vsyncadd [#allocation5], 4294967280 }
  0xf6   :  { %118 = vsyncpa [#allocation5], 1 }

</bundles_post_ra>
